<compile_context>
chip_gen: v6e
topology: v6e:2x2x1
jax: 0.10.0
libtpu: 0.0.40
codegen_flags: <defaults>
</compile_context>

<pallas_src>
import functools

import jax
import jax.numpy as jnp
from jax.experimental import pallas as pl
from jax.experimental.pallas import tpu as pltpu

LN_EPS = 1e-5


def encoder_mlp_kernel(x_ref, w1_ref, b1_ref, w2_ref, b2_ref,
                       g_ref, beta_ref, w3_ref, b3_ref, out_ref,
                       *, compute_dtype, inv_hidden):
    # fc1 + relu  (MXU: compute_dtype operands, f32 accumulation)
    x = x_ref[...].astype(compute_dtype)
    h = jnp.dot(x, w1_ref[...], preferred_element_type=jnp.float32)
    h = jnp.maximum(h + b1_ref[...].astype(jnp.float32), 0.0)

    # fc2
    h = jnp.dot(h.astype(compute_dtype), w2_ref[...],
                preferred_element_type=jnp.float32)
    h = h + b2_ref[...].astype(jnp.float32)

    # LayerNorm over hidden dim (f32 statistics; rsqrt goes to the EUP)
    mean = jnp.sum(h, axis=-1, keepdims=True) * inv_hidden
    c = h - mean
    var = jnp.sum(c * c, axis=-1, keepdims=True) * inv_hidden
    h = c * jax.lax.rsqrt(var + LN_EPS)
    h = h * g_ref[...].astype(jnp.float32) + beta_ref[...].astype(jnp.float32)

    # relu
    h = jnp.maximum(h, 0.0)

    # fc3
    out = jnp.dot(h.astype(compute_dtype), w3_ref[...],
                  preferred_element_type=jnp.float32)
    out = out + b3_ref[...].astype(jnp.float32)
    out_ref[...] = out.astype(out_ref.dtype)


def _round_up(x, m):
    return ((x + m - 1) // m) * m


def _vmem_budget_bytes():
    """~75% of this generation's physical VMEM (v5e/v6e: 128 MiB -> ~96 MiB,
    v7x: 64 MiB -> ~48 MiB), leaving headroom for compiler-internal scratch."""
    try:
        phys = int(pltpu.get_tpu_info().vmem_capacity_bytes)
    except Exception:
        phys = 64 * 1024 * 1024  # conservative fallback (v7x-class part)
    return (phys * 3) // 4


def _choose_tile_m(m_rows, input_dim, hidden_dim, out_cols, in_bytes, out_bytes,
                   weight_bytes, vmem_budget):
    """Row-tile size derived from the VMEM budget: double-buffered x / out tiles
    plus a generous allowance for f32 intermediates and bf16 MXU copies."""
    per_row = (2 * input_dim * in_bytes        # x tile (double-buffered)
               + 2 * out_cols * out_bytes      # out tile (double-buffered)
               + 6 * hidden_dim * 4            # f32 intermediates (fc1/fc2/LN temps)
               + 2 * hidden_dim * 2)           # bf16 copies fed to the MXU
    # Count weights twice (safe even if single-buffering falls back) + fixed slack.
    avail = vmem_budget - 2 * weight_bytes - (4 << 20)
    t = max(avail // per_row, 8)
    t = min(t, 4096, _round_up(m_rows, 8))
    # Keep >=2 grid steps when there's enough work so the "parallel" row axis can
    # shard across v7x's two TensorCores (one extra ~0.35us step elsewhere is noise).
    if m_rows >= 2048:
        t = min(t, _round_up(-(-m_rows // 2), 8))
    return max((t // 8) * 8, 8)


def prepare_params(params, compute_dtype=jnp.bfloat16):
    """One-time parameter conversion: matmul weights -> compute_dtype (full MXU rate,
    half the resident weight VMEM); biases / LayerNorm params stay f32 so all
    elementwise math is exact f32. Call once outside the step function so the casts
    don't cost an HBM pass per forward."""
    w1, b1, w2, b2, gamma, beta, w3, b3 = params

    def cast(w):
        return w if w.dtype == compute_dtype else w.astype(compute_dtype)

    def f32(p):
        return p if p.dtype == jnp.float32 else p.astype(jnp.float32)

    return (cast(w1), f32(b1), cast(w2), f32(b2),
            f32(gamma), f32(beta), cast(w3), f32(b3))


def encoder_mlp(ins, params, num_objects, input_dim, *,
                compute_dtype=jnp.bfloat16, out_dtype=jnp.float32):
    """Pallas implementation of EncoderMLP.forward.

    ins: anything that flattens to (-1, num_objects, input_dim). bf16 inputs are
         used as-is (halves the dominant input DMA); f32 inputs are cast in-kernel.
    params: raw f32 params or (preferably) the output of prepare_params().
    Returns (B, num_objects, output_dim) in out_dtype (use bf16 if downstream allows
    to halve output writeback).
    """
    # Idempotent: no-op if the caller already ran prepare_params().
    w1, b1, w2, b2, gamma, beta, w3, b3 = prepare_params(params, compute_dtype)
    hidden_dim = w1.shape[1]
    output_dim = w3.shape[1]

    # fc3 lane padding only when the output is wide enough that lane-dense stores
    # beat the extra writeback + wrapper slice; for tiny outputs (e.g. 8) padding to
    # 128 would inflate output HBM traffic 16x, so keep the true width and eat the
    # masked vst instead. (Wide-output callers should ideally pre-pad at prep time.)
    if output_dim >= 64 and output_dim % 128 != 0:
        pad = _round_up(output_dim, 128) - output_dim
        w3 = jnp.pad(w3, ((0, 0), (0, pad)))
        b3 = jnp.pad(b3, ((0, 0), (0, pad)))
    out_cols = w3.shape[1]

    x2d = jnp.reshape(ins, (-1, num_objects, input_dim)).reshape(-1, input_dim)
    M = x2d.shape[0]
    B = M // num_objects

    weight_args = (w1, b1, w2, b2, gamma, beta, w3, b3)
    weight_bytes = sum(int(a.size) * a.dtype.itemsize for a in weight_args)
    vmem_budget = _vmem_budget_bytes()
    tile_m = _choose_tile_m(M, input_dim, hidden_dim, out_cols,
                            x2d.dtype.itemsize, jnp.dtype(out_dtype).itemsize,
                            weight_bytes, vmem_budget)

    kernel = functools.partial(
        encoder_mlp_kernel,
        compute_dtype=compute_dtype,
        inv_hidden=float(1.0 / hidden_dim),
    )

    def weight_spec(a, single_buffer):
        # Grid-invariant operand (constant index_map -> fetched once). Buffered(1)
        # additionally drops the second, never-used pipeline buffer.
        if single_buffer:
            return pl.BlockSpec(a.shape, lambda *_: (0,) * a.ndim,
                                pipeline_mode=pl.Buffered(1))
        return pl.BlockSpec(a.shape, lambda *_: (0,) * a.ndim)

    # Row tiling: one full block for small M; otherwise tile_m-row blocks with any
    # ragged tail handled as a masked last grid step of the same call (out-of-bounds
    # rows of the last input block are dropped on store) -> no output concatenate,
    # no second call that re-DMAs the weights.
    if M <= tile_m:
        tile, grid = M, 1
    else:
        tile, grid = tile_m, pl.cdiv(M, tile_m)

    def build(single_buffer_weights):
        return pl.pallas_call(
            kernel,
            out_shape=jax.ShapeDtypeStruct((M, out_cols), out_dtype),
            grid_spec=pltpu.PrefetchScalarGridSpec(
                num_scalar_prefetch=0,
                grid=(grid,),
                in_specs=[pl.BlockSpec((tile, input_dim), lambda i: (i, 0))]
                         + [weight_spec(a, single_buffer_weights)
                            for a in weight_args],
                out_specs=pl.BlockSpec((tile, out_cols), lambda i: (i, 0)),
            ),
            compiler_params=pltpu.CompilerParams(
                # Row axis is embarrassingly parallel -> megacore-shardable on v7x
                # (no-op on single-TC v5e/v6e).
                dimension_semantics=("parallel",),
                vmem_limit_bytes=int(vmem_budget),
            ),
        )

    args = (x2d,) + weight_args
    try:
        out2d = build(True)(*args)
    except Exception:
        # Compatibility guard: fall back to default double-buffered weight specs on
        # jax versions that reject pl.Buffered(1) as a pallas_call pipeline_mode.
        out2d = build(False)(*args)

    if out_cols != output_dim:
        out2d = out2d[:, :output_dim]
    return out2d.reshape(B, num_objects, output_dim)


def init_params(key, input_dim, hidden_dim, output_dim):
    """Deterministic parameter init (shapes match the PyTorch module)."""
    ks = jax.random.split(key, 6)

    def lin(kw, kb, fan_in, fan_out):
        bound = 1.0 / jnp.sqrt(fan_in)
        w = jax.random.uniform(kw, (fan_in, fan_out), jnp.float32, -bound, bound)
        b = jax.random.uniform(kb, (1, fan_out), jnp.float32, -bound, bound)
        return w, b

    w1, b1 = lin(ks[0], ks[1], input_dim, hidden_dim)
    w2, b2 = lin(ks[2], ks[3], hidden_dim, hidden_dim)
    w3, b3 = lin(ks[4], ks[5], hidden_dim, output_dim)
    gamma = jnp.ones((1, hidden_dim), jnp.float32)
    beta = jnp.zeros((1, hidden_dim), jnp.float32)
    return (w1, b1, w2, b2, gamma, beta, w3, b3)


def encoder_mlp_ref(ins, params, num_objects, input_dim, *,
                    compute_dtype=jnp.float32):
    """Pure-JAX reference. compute_dtype mirrors the kernel's matmul operand dtype
    (f32 accumulation + f32 LayerNorm in both cases)."""
    w1, b1, w2, b2, gamma, beta, w3, b3 = params
    cd = compute_dtype
    x = jnp.reshape(ins, (-1, num_objects, input_dim)).reshape(-1, input_dim)

    def dense(h, w, b):
        return jnp.dot(h.astype(cd), w.astype(cd),
                       preferred_element_type=jnp.float32) + b

    h = jax.nn.relu(dense(x, w1, b1))
    h = dense(h, w2, b2)
    mean = jnp.mean(h, axis=-1, keepdims=True)
    var = jnp.mean((h - mean) ** 2, axis=-1, keepdims=True)
    h = (h - mean) * jax.lax.rsqrt(var + LN_EPS) * gamma + beta
    h = jax.nn.relu(h)
    out = dense(h, w3, b3)
    return out.reshape(-1, num_objects, w3.shape[1])


if __name__ == "__main__":
    # Small shapes consistent with the module's forward.
    batch = 2
    num_objects = 4
    input_dim = 16
    hidden_dim = 32
    output_dim = 8

    key = jax.random.PRNGKey(0)
    k_in, k_p = jax.random.split(key)
    ins = jax.random.normal(k_in, (batch, num_objects, input_dim), jnp.float32)
    params = init_params(k_p, input_dim, hidden_dim, output_dim)

    # One-time weight conversion (bf16 MXU operands) -> no per-call weight casts.
    prepped = prepare_params(params)

    out = encoder_mlp(ins, prepped, num_objects, input_dim)
    out = jax.block_until_ready(out)
    assert out.shape == (batch, num_objects, output_dim)

    # Check against a reference that mirrors the operand dtype (tight tolerance).
    ref_bf16 = encoder_mlp_ref(ins, params, num_objects, input_dim,
                               compute_dtype=jnp.bfloat16)
    assert jnp.allclose(out, ref_bf16, atol=5e-4, rtol=5e-4), \
        "mismatch vs bf16-operand reference"

    # Sanity check against the full-f32 reference (within bf16 rounding).
    ref_f32 = encoder_mlp_ref(ins, params, num_objects, input_dim,
                              compute_dtype=jnp.float32)
    assert jnp.allclose(out, ref_f32, atol=5e-2, rtol=5e-2), \
        "mismatch vs f32 reference"

    print("KERNEL_OK")
</pallas_src>

<mosaic_0001>
module attributes {stable_mosaic.version = 11 : i64} {
  func.func @encoder_mlp_kernel(%arg0: i32, %arg1: memref<8x16xf32, #tpu.memory_space<vmem>>, %arg2: memref<16x32xbf16, #tpu.memory_space<vmem>>, %arg3: memref<1x32xf32, #tpu.memory_space<vmem>>, %arg4: memref<32x32xbf16, #tpu.memory_space<vmem>>, %arg5: memref<1x32xf32, #tpu.memory_space<vmem>>, %arg6: memref<1x32xf32, #tpu.memory_space<vmem>>, %arg7: memref<1x32xf32, #tpu.memory_space<vmem>>, %arg8: memref<32x8xbf16, #tpu.memory_space<vmem>>, %arg9: memref<1x8xf32, #tpu.memory_space<vmem>>, %arg10: memref<8x8xf32, #tpu.memory_space<vmem>>) attributes {dimension_semantics = [#tpu.dimension_semantics<parallel>], iteration_bounds = array<i64: 1>, scalar_prefetch = 0 : i64, scratch_operands = 0 : i64, tpu.core_type = #tpu.core_type<tc>, window_params = [{transform_indices = @transform_0, window_bounds = array<i64: 8, 16>}, {pipeline_mode = #tpu.pipeline_mode<synchronous>, transform_indices = @transform_1, window_bounds = array<i64: 16, 32>}, {pipeline_mode = #tpu.pipeline_mode<synchronous>, transform_indices = @transform_2, window_bounds = array<i64: 1, 32>}, {pipeline_mode = #tpu.pipeline_mode<synchronous>, transform_indices = @transform_3, window_bounds = array<i64: 32, 32>}, {pipeline_mode = #tpu.pipeline_mode<synchronous>, transform_indices = @transform_4, window_bounds = array<i64: 1, 32>}, {pipeline_mode = #tpu.pipeline_mode<synchronous>, transform_indices = @transform_5, window_bounds = array<i64: 1, 32>}, {pipeline_mode = #tpu.pipeline_mode<synchronous>, transform_indices = @transform_6, window_bounds = array<i64: 1, 32>}, {pipeline_mode = #tpu.pipeline_mode<synchronous>, transform_indices = @transform_7, window_bounds = array<i64: 32, 8>}, {pipeline_mode = #tpu.pipeline_mode<synchronous>, transform_indices = @transform_8, window_bounds = array<i64: 1, 8>}, {transform_indices = @transform_9, window_bounds = array<i64: 8, 8>}]} {
    %c0 = arith.constant 0 : index
    %c0_0 = arith.constant 0 : index
    %0 = vector.load %arg1[%c0, %c0_0] : memref<8x16xf32, #tpu.memory_space<vmem>>, vector<8x16xf32>
    %1 = arith.truncf %0 : vector<8x16xf32> to vector<8x16xbf16>
    %c0_1 = arith.constant 0 : index
    %c0_2 = arith.constant 0 : index
    %2 = vector.load %arg2[%c0_1, %c0_2] : memref<16x32xbf16, #tpu.memory_space<vmem>>, vector<16x32xbf16>
    %cst = arith.constant dense<0.000000e+00> : vector<8x32xf32>
    %3 = tpu.matmul %1, %2, %cst {dimension_numbers = #tpu.dot_dimension_numbers<[1], [0], [0], [1], [0, 0, 1, 1], [], []>} : vector<8x16xbf16>, vector<16x32xbf16>, vector<8x32xf32> -> vector<8x32xf32>
    %c0_3 = arith.constant 0 : index
    %c0_4 = arith.constant 0 : index
    %4 = vector.load %arg3[%c0_3, %c0_4] : memref<1x32xf32, #tpu.memory_space<vmem>>, vector<1x32xf32>
    %5 = vector.broadcast %4 : vector<1x32xf32> to vector<8x32xf32>
    %6 = arith.addf %3, %5 : vector<8x32xf32>
    %cst_5 = arith.constant 0.000000e+00 : f32
    %7 = vector.broadcast %cst_5 : f32 to vector<8x32xf32>
    %8 = arith.maximumf %6, %7 : vector<8x32xf32>
    %9 = arith.truncf %8 : vector<8x32xf32> to vector<8x32xbf16>
    %c0_6 = arith.constant 0 : index
    %c0_7 = arith.constant 0 : index
    %10 = vector.load %arg4[%c0_6, %c0_7] : memref<32x32xbf16, #tpu.memory_space<vmem>>, vector<32x32xbf16>
    %cst_8 = arith.constant dense<0.000000e+00> : vector<8x32xf32>
    %11 = tpu.matmul %9, %10, %cst_8 {dimension_numbers = #tpu.dot_dimension_numbers<[1], [0], [0], [1], [0, 0, 1, 1], [], []>} : vector<8x32xbf16>, vector<32x32xbf16>, vector<8x32xf32> -> vector<8x32xf32>
    %c0_9 = arith.constant 0 : index
    %c0_10 = arith.constant 0 : index
    %12 = vector.load %arg5[%c0_9, %c0_10] : memref<1x32xf32, #tpu.memory_space<vmem>>, vector<1x32xf32>
    %13 = vector.broadcast %12 : vector<1x32xf32> to vector<8x32xf32>
    %14 = arith.addf %11, %13 : vector<8x32xf32>
    %cst_11 = arith.constant dense<0.000000e+00> : vector<8xf32>
    %15 = vector.multi_reduction <add>, %14, %cst_11 [1] : vector<8x32xf32> to vector<8xf32>
    %16 = vector.shape_cast %15 : vector<8xf32> to vector<8x1xf32>
    %cst_12 = arith.constant 3.125000e-02 : f32
    %17 = vector.broadcast %cst_12 : f32 to vector<8x1xf32>
    %18 = arith.mulf %16, %17 : vector<8x1xf32>
    %19 = vector.broadcast %18 : vector<8x1xf32> to vector<8x32xf32>
    %20 = arith.subf %14, %19 : vector<8x32xf32>
    %21 = arith.mulf %20, %20 : vector<8x32xf32>
    %cst_13 = arith.constant dense<0.000000e+00> : vector<8xf32>
    %22 = vector.multi_reduction <add>, %21, %cst_13 [1] : vector<8x32xf32> to vector<8xf32>
    %23 = vector.shape_cast %22 : vector<8xf32> to vector<8x1xf32>
    %cst_14 = arith.constant 3.125000e-02 : f32
    %24 = vector.broadcast %cst_14 : f32 to vector<8x1xf32>
    %25 = arith.mulf %23, %24 : vector<8x1xf32>
    %cst_15 = arith.constant 9.99999974E-6 : f32
    %26 = vector.broadcast %cst_15 : f32 to vector<8x1xf32>
    %27 = arith.addf %25, %26 : vector<8x1xf32>
    %28 = math.rsqrt %27 : vector<8x1xf32>
    %29 = vector.broadcast %28 : vector<8x1xf32> to vector<8x32xf32>
    %30 = arith.mulf %20, %29 : vector<8x32xf32>
    %c0_16 = arith.constant 0 : index
    %c0_17 = arith.constant 0 : index
    %31 = vector.load %arg6[%c0_16, %c0_17] : memref<1x32xf32, #tpu.memory_space<vmem>>, vector<1x32xf32>
    %32 = vector.broadcast %31 : vector<1x32xf32> to vector<8x32xf32>
    %33 = arith.mulf %30, %32 : vector<8x32xf32>
    %c0_18 = arith.constant 0 : index
    %c0_19 = arith.constant 0 : index
    %34 = vector.load %arg7[%c0_18, %c0_19] : memref<1x32xf32, #tpu.memory_space<vmem>>, vector<1x32xf32>
    %35 = vector.broadcast %34 : vector<1x32xf32> to vector<8x32xf32>
    %36 = arith.addf %33, %35 : vector<8x32xf32>
    %cst_20 = arith.constant 0.000000e+00 : f32
    %37 = vector.broadcast %cst_20 : f32 to vector<8x32xf32>
    %38 = arith.maximumf %36, %37 : vector<8x32xf32>
    %39 = arith.truncf %38 : vector<8x32xf32> to vector<8x32xbf16>
    %c0_21 = arith.constant 0 : index
    %c0_22 = arith.constant 0 : index
    %40 = vector.load %arg8[%c0_21, %c0_22] : memref<32x8xbf16, #tpu.memory_space<vmem>>, vector<32x8xbf16>
    %cst_23 = arith.constant dense<0.000000e+00> : vector<8x8xf32>
    %41 = tpu.matmul %39, %40, %cst_23 {dimension_numbers = #tpu.dot_dimension_numbers<[1], [0], [0], [1], [0, 0, 1, 1], [], []>} : vector<8x32xbf16>, vector<32x8xbf16>, vector<8x8xf32> -> vector<8x8xf32>
    %c0_24 = arith.constant 0 : index
    %c0_25 = arith.constant 0 : index
    %42 = vector.load %arg9[%c0_24, %c0_25] : memref<1x8xf32, #tpu.memory_space<vmem>>, vector<1x8xf32>
    %43 = vector.broadcast %42 : vector<1x8xf32> to vector<8x8xf32>
    %44 = arith.addf %41, %43 : vector<8x8xf32>
    %c0_26 = arith.constant 0 : index
    %c0_27 = arith.constant 0 : index
    %45 = vector.load %arg10[%c0_26, %c0_27] : memref<8x8xf32, #tpu.memory_space<vmem>>, vector<8x8xf32>
    tpu.vector_store %arg10[%c0_26, %c0_27], %44 {strides = array<i32>} : memref<8x8xf32, #tpu.memory_space<vmem>>, vector<8x8xf32>,
    return
  }
  func.func @transform_0(%arg0: i32) -> (i32, i32) {
    %c0_i32 = arith.constant 0 : i32
    %c0_i32_0 = arith.constant 0 : i32
    return %arg0, %c0_i32 : i32, i32
  }
  func.func @transform_1(%arg0: i32) -> (i32, i32) {
    %c0_i32 = arith.constant 0 : i32
    %c0_i32_0 = arith.constant 0 : i32
    %c0_i32_1 = arith.constant 0 : i32
    return %c0_i32, %c0_i32_0 : i32, i32
  }
  func.func @transform_2(%arg0: i32) -> (i32, i32) {
    %c0_i32 = arith.constant 0 : i32
    %c0_i32_0 = arith.constant 0 : i32
    %c0_i32_1 = arith.constant 0 : i32
    return %c0_i32, %c0_i32_0 : i32, i32
  }
  func.func @transform_3(%arg0: i32) -> (i32, i32) {
    %c0_i32 = arith.constant 0 : i32
    %c0_i32_0 = arith.constant 0 : i32
    %c0_i32_1 = arith.constant 0 : i32
    return %c0_i32, %c0_i32_0 : i32, i32
  }
  func.func @transform_4(%arg0: i32) -> (i32, i32) {
    %c0_i32 = arith.constant 0 : i32
    %c0_i32_0 = arith.constant 0 : i32
    %c0_i32_1 = arith.constant 0 : i32
    return %c0_i32, %c0_i32_0 : i32, i32
  }
  func.func @transform_5(%arg0: i32) -> (i32, i32) {
    %c0_i32 = arith.constant 0 : i32
    %c0_i32_0 = arith.constant 0 : i32
    %c0_i32_1 = arith.constant 0 : i32
    return %c0_i32, %c0_i32_0 : i32, i32
  }
  func.func @transform_6(%arg0: i32) -> (i32, i32) {
    %c0_i32 = arith.constant 0 : i32
    %c0_i32_0 = arith.constant 0 : i32
    %c0_i32_1 = arith.constant 0 : i32
    return %c0_i32, %c0_i32_0 : i32, i32
  }
  func.func @transform_7(%arg0: i32) -> (i32, i32) {
    %c0_i32 = arith.constant 0 : i32
    %c0_i32_0 = arith.constant 0 : i32
    %c0_i32_1 = arith.constant 0 : i32
    return %c0_i32, %c0_i32_0 : i32, i32
  }
  func.func @transform_8(%arg0: i32) -> (i32, i32) {
    %c0_i32 = arith.constant 0 : i32
    %c0_i32_0 = arith.constant 0 : i32
    %c0_i32_1 = arith.constant 0 : i32
    return %c0_i32, %c0_i32_0 : i32, i32
  }
  func.func @transform_9(%arg0: i32) -> (i32, i32) {
    %c0_i32 = arith.constant 0 : i32
    %c0_i32_0 = arith.constant 0 : i32
    return %arg0, %c0_i32 : i32, i32
  }
}

module attributes {stable_mosaic.version = 11 : i64} {
  func.func @encoder_mlp_kernel(%arg0: i32, %arg1: memref<8x16xf32, #tpu.memory_space<vmem>>, %arg2: memref<16x32xbf16, #tpu.memory_space<vmem>>, %arg3: memref<1x32xf32, #tpu.memory_space<vmem>>, %arg4: memref<32x32xbf16, #tpu.memory_space<vmem>>, %arg5: memref<1x32xf32, #tpu.memory_space<vmem>>, %arg6: memref<1x32xf32, #tpu.memory_space<vmem>>, %arg7: memref<1x32xf32, #tpu.memory_space<vmem>>, %arg8: memref<32x8xbf16, #tpu.memory_space<vmem>>, %arg9: memref<1x8xf32, #tpu.memory_space<vmem>>, %arg10: memref<8x8xf32, #tpu.memory_space<vmem>>) attributes {dimension_semantics = [#tpu.dimension_semantics<parallel>], iteration_bounds = array<i64: 1>, scalar_prefetch = 0 : i64, scratch_operands = 0 : i64, tpu.core_type = #tpu.core_type<tc>, window_params = [{transform_indices = @transform_0, window_bounds = array<i64: 8, 16>}, {pipeline_mode = #tpu.pipeline_mode<synchronous>, transform_indices = @transform_1, window_bounds = array<i64: 16, 32>}, {pipeline_mode = #tpu.pipeline_mode<synchronous>, transform_indices = @transform_2, window_bounds = array<i64: 1, 32>}, {pipeline_mode = #tpu.pipeline_mode<synchronous>, transform_indices = @transform_3, window_bounds = array<i64: 32, 32>}, {pipeline_mode = #tpu.pipeline_mode<synchronous>, transform_indices = @transform_4, window_bounds = array<i64: 1, 32>}, {pipeline_mode = #tpu.pipeline_mode<synchronous>, transform_indices = @transform_5, window_bounds = array<i64: 1, 32>}, {pipeline_mode = #tpu.pipeline_mode<synchronous>, transform_indices = @transform_6, window_bounds = array<i64: 1, 32>}, {pipeline_mode = #tpu.pipeline_mode<synchronous>, transform_indices = @transform_7, window_bounds = array<i64: 32, 8>}, {pipeline_mode = #tpu.pipeline_mode<synchronous>, transform_indices = @transform_8, window_bounds = array<i64: 1, 8>}, {transform_indices = @transform_9, window_bounds = array<i64: 8, 8>}]} {
    %c0 = arith.constant 0 : index
    %c0_0 = arith.constant 0 : index
    %0 = vector.load %arg1[%c0, %c0_0] : memref<8x16xf32, #tpu.memory_space<vmem>>, vector<8x16xf32>
    %1 = arith.truncf %0 : vector<8x16xf32> to vector<8x16xbf16>
    %c0_1 = arith.constant 0 : index
    %c0_2 = arith.constant 0 : index
    %2 = vector.load %arg2[%c0_1, %c0_2] : memref<16x32xbf16, #tpu.memory_space<vmem>>, vector<16x32xbf16>
    %cst = arith.constant dense<0.000000e+00> : vector<8x32xf32>
    %3 = tpu.matmul %1, %2, %cst {dimension_numbers = #tpu.dot_dimension_numbers<[1], [0], [0], [1], [0, 0, 1, 1], [], []>} : vector<8x16xbf16>, vector<16x32xbf16>, vector<8x32xf32> -> vector<8x32xf32>
    %c0_3 = arith.constant 0 : index
    %c0_4 = arith.constant 0 : index
    %4 = vector.load %arg3[%c0_3, %c0_4] : memref<1x32xf32, #tpu.memory_space<vmem>>, vector<1x32xf32>
    %5 = vector.broadcast %4 : vector<1x32xf32> to vector<8x32xf32>
    %6 = arith.addf %3, %5 : vector<8x32xf32>
    %cst_5 = arith.constant 0.000000e+00 : f32
    %7 = vector.broadcast %cst_5 : f32 to vector<8x32xf32>
    %8 = arith.maximumf %6, %7 : vector<8x32xf32>
    %9 = arith.truncf %8 : vector<8x32xf32> to vector<8x32xbf16>
    %c0_6 = arith.constant 0 : index
    %c0_7 = arith.constant 0 : index
    %10 = vector.load %arg4[%c0_6, %c0_7] : memref<32x32xbf16, #tpu.memory_space<vmem>>, vector<32x32xbf16>
    %cst_8 = arith.constant dense<0.000000e+00> : vector<8x32xf32>
    %11 = tpu.matmul %9, %10, %cst_8 {dimension_numbers = #tpu.dot_dimension_numbers<[1], [0], [0], [1], [0, 0, 1, 1], [], []>} : vector<8x32xbf16>, vector<32x32xbf16>, vector<8x32xf32> -> vector<8x32xf32>
    %c0_9 = arith.constant 0 : index
    %c0_10 = arith.constant 0 : index
    %12 = vector.load %arg5[%c0_9, %c0_10] : memref<1x32xf32, #tpu.memory_space<vmem>>, vector<1x32xf32>
    %13 = vector.broadcast %12 : vector<1x32xf32> to vector<8x32xf32>
    %14 = arith.addf %11, %13 : vector<8x32xf32>
    %cst_11 = arith.constant dense<0.000000e+00> : vector<8xf32>
    %15 = vector.multi_reduction <add>, %14, %cst_11 [1] : vector<8x32xf32> to vector<8xf32>
    %16 = vector.shape_cast %15 : vector<8xf32> to vector<8x1xf32>
    %cst_12 = arith.constant 3.125000e-02 : f32
    %17 = vector.broadcast %cst_12 : f32 to vector<8x1xf32>
    %18 = arith.mulf %16, %17 : vector<8x1xf32>
    %19 = vector.broadcast %18 : vector<8x1xf32> to vector<8x32xf32>
    %20 = arith.subf %14, %19 : vector<8x32xf32>
    %21 = arith.mulf %20, %20 : vector<8x32xf32>
    %cst_13 = arith.constant dense<0.000000e+00> : vector<8xf32>
    %22 = vector.multi_reduction <add>, %21, %cst_13 [1] : vector<8x32xf32> to vector<8xf32>
    %23 = vector.shape_cast %22 : vector<8xf32> to vector<8x1xf32>
    %cst_14 = arith.constant 3.125000e-02 : f32
    %24 = vector.broadcast %cst_14 : f32 to vector<8x1xf32>
    %25 = arith.mulf %23, %24 : vector<8x1xf32>
    %cst_15 = arith.constant 9.99999974E-6 : f32
    %26 = vector.broadcast %cst_15 : f32 to vector<8x1xf32>
    %27 = arith.addf %25, %26 : vector<8x1xf32>
    %28 = math.rsqrt %27 : vector<8x1xf32>
    %29 = vector.broadcast %28 : vector<8x1xf32> to vector<8x32xf32>
    %30 = arith.mulf %20, %29 : vector<8x32xf32>
    %c0_16 = arith.constant 0 : index
    %c0_17 = arith.constant 0 : index
    %31 = vector.load %arg6[%c0_16, %c0_17] : memref<1x32xf32, #tpu.memory_space<vmem>>, vector<1x32xf32>
    %32 = vector.broadcast %31 : vector<1x32xf32> to vector<8x32xf32>
    %33 = arith.mulf %30, %32 : vector<8x32xf32>
    %c0_18 = arith.constant 0 : index
    %c0_19 = arith.constant 0 : index
    %34 = vector.load %arg7[%c0_18, %c0_19] : memref<1x32xf32, #tpu.memory_space<vmem>>, vector<1x32xf32>
    %35 = vector.broadcast %34 : vector<1x32xf32> to vector<8x32xf32>
    %36 = arith.addf %33, %35 : vector<8x32xf32>
    %cst_20 = arith.constant 0.000000e+00 : f32
    %37 = vector.broadcast %cst_20 : f32 to vector<8x32xf32>
    %38 = arith.maximumf %36, %37 : vector<8x32xf32>
    %39 = arith.truncf %38 : vector<8x32xf32> to vector<8x32xbf16>
    %c0_21 = arith.constant 0 : index
    %c0_22 = arith.constant 0 : index
    %40 = vector.load %arg8[%c0_21, %c0_22] : memref<32x8xbf16, #tpu.memory_space<vmem>>, vector<32x8xbf16>
    %cst_23 = arith.constant dense<0.000000e+00> : vector<8x8xf32>
    %41 = tpu.matmul %39, %40, %cst_23 {dimension_numbers = #tpu.dot_dimension_numbers<[1], [0], [0], [1], [0, 0, 1, 1], [], []>} : vector<8x32xbf16>, vector<32x8xbf16>, vector<8x8xf32> -> vector<8x8xf32>
    %c0_24 = arith.constant 0 : index
    %c0_25 = arith.constant 0 : index
    %42 = vector.load %arg9[%c0_24, %c0_25] : memref<1x8xf32, #tpu.memory_space<vmem>>, vector<1x8xf32>
    %43 = vector.broadcast %42 : vector<1x8xf32> to vector<8x8xf32>
    %44 = arith.addf %41, %43 : vector<8x8xf32>
    %c0_26 = arith.constant 0 : index
    %c0_27 = arith.constant 0 : index
    %45 = vector.load %arg10[%c0_26, %c0_27] : memref<8x8xf32, #tpu.memory_space<vmem>>, vector<8x8xf32>
    tpu.vector_store %arg10[%c0_26, %c0_27], %44 {strides = array<i32>} : memref<8x8xf32, #tpu.memory_space<vmem>>, vector<8x8xf32>,
    return
  }
  func.func @transform_0(%arg0: i32) -> (i32, i32) {
    %c0_i32 = arith.constant 0 : i32
    %c0_i32_0 = arith.constant 0 : i32
    return %arg0, %c0_i32 : i32, i32
  }
  func.func @transform_1(%arg0: i32) -> (i32, i32) {
    %c0_i32 = arith.constant 0 : i32
    %c0_i32_0 = arith.constant 0 : i32
    %c0_i32_1 = arith.constant 0 : i32
    return %c0_i32, %c0_i32_0 : i32, i32
  }
  func.func @transform_2(%arg0: i32) -> (i32, i32) {
    %c0_i32 = arith.constant 0 : i32
    %c0_i32_0 = arith.constant 0 : i32
    %c0_i32_1 = arith.constant 0 : i32
    return %c0_i32, %c0_i32_0 : i32, i32
  }
  func.func @transform_3(%arg0: i32) -> (i32, i32) {
    %c0_i32 = arith.constant 0 : i32
    %c0_i32_0 = arith.constant 0 : i32
    %c0_i32_1 = arith.constant 0 : i32
    return %c0_i32, %c0_i32_0 : i32, i32
  }
  func.func @transform_4(%arg0: i32) -> (i32, i32) {
    %c0_i32 = arith.constant 0 : i32
    %c0_i32_0 = arith.constant 0 : i32
    %c0_i32_1 = arith.constant 0 : i32
    return %c0_i32, %c0_i32_0 : i32, i32
  }
  func.func @transform_5(%arg0: i32) -> (i32, i32) {
    %c0_i32 = arith.constant 0 : i32
    %c0_i32_0 = arith.constant 0 : i32
    %c0_i32_1 = arith.constant 0 : i32
    return %c0_i32, %c0_i32_0 : i32, i32
  }
  func.func @transform_6(%arg0: i32) -> (i32, i32) {
    %c0_i32 = arith.constant 0 : i32
    %c0_i32_0 = arith.constant 0 : i32
    %c0_i32_1 = arith.constant 0 : i32
    return %c0_i32, %c0_i32_0 : i32, i32
  }
  func.func @transform_7(%arg0: i32) -> (i32, i32) {
    %c0_i32 = arith.constant 0 : i32
    %c0_i32_0 = arith.constant 0 : i32
    %c0_i32_1 = arith.constant 0 : i32
    return %c0_i32, %c0_i32_0 : i32, i32
  }
  func.func @transform_8(%arg0: i32) -> (i32, i32) {
    %c0_i32 = arith.constant 0 : i32
    %c0_i32_0 = arith.constant 0 : i32
    %c0_i32_1 = arith.constant 0 : i32
    return %c0_i32, %c0_i32_0 : i32, i32
  }
  func.func @transform_9(%arg0: i32) -> (i32, i32) {
    %c0_i32 = arith.constant 0 : i32
    %c0_i32_0 = arith.constant 0 : i32
    return %arg0, %c0_i32 : i32, i32
  }
}

</mosaic_0001>

<bundles_post_ra>
// kernel: tpu_custom_call.1
= control target key start
LH: loop header
LB: loop body
LE: loop exit
PB: predicated region body
PF: predicated region fallthrough
CT: control target
= control target key end

     0   :  { %14 = vsyncpa [#allocation3], 0  ;;  %s558_s0 = inlined_call_operand.vmem [shape: f32[8,16], index: 0, kind: input, shape index: {}]   ;;  %s559_s1 = inlined_call_operand.hbm [shape: bf16[16,32], index: 1, kind: input, shape index: {}]   ;;  %s560_s2 = inlined_call_operand.vmem [shape: f32[1,32], index: 2, kind: input, shape index: {}]   ;;  %s561_s3 = inlined_call_operand.vmem [shape: bf16[32,32], index: 3, kind: input, shape index: {}]   ;;  %s562_s4 = inlined_call_operand.hbm [shape: f32[1,32], index: 4, kind: input, shape index: {}]   ;;  %s563_s5 = inlined_call_operand.hbm [shape: f32[1,32], index: 5, kind: input, shape index: {}]   ;;  %s564_s6 = inlined_call_operand.vmem [shape: f32[1,32], index: 6, kind: input, shape index: {}]   ;;  %s565_s7 = inlined_call_operand.vmem [shape: bf16[32,8], index: 7, kind: input, shape index: {}]   ;;  %s566_s8 = inlined_call_operand.vmem [shape: f32[1,8], index: 8, kind: input, shape index: {}]   ;;  %s567_s9 = inlined_call_operand.hbm [shape: f32[8,8], index: 9, kind: output, shape index: {}]  }
   0x1   :  { %15 = vsyncpa [#allocation6], 0 }
   0x2   :  { %16 = vsyncpa [#allocation4], 0  ;;  %s460_s30 = smov [#allocation5]   ;;  %s461_s11 = smov [#allocation2]  }
   0x3   :  { %s41_s10 = sshll.u32 %s460_s30, 4  ;;  %s24_s12 = sshll.u32 %s461_s11, 4  ;;  %s42_s10 = int_to_ptr.vmem [resolvable:$true] %s41_s10  ;;  %s25_s12 = int_to_ptr.vmem [resolvable:$true] %s24_s12 }
   0x4   :  { %s382_s13 = scalar_lea.vmem %s42_s10, 16  ;;  %s386_s14 = scalar_lea.vmem %s42_s10, 32 }
   0x5   :  { %p383_p0 = scmp.ne.s32.totalorder %s42_s10, %s382_s13  ;;  %p387_p1 = scmp.lt.s32.totalorder %s42_s10, %s42_s10 }
   0x6   :  { %p388_p2 = scmp.lt.s32.totalorder %s386_s14, %s382_s13 }
   0x8   :  { %p389_p3 = por %p388_p2, %p387_p1 }
   0xa   :  { %p390_p4 = pnand %p389_p3, %p383_p0 }
   0xc   :  { %393 = shalt.err (!%p390_p4)
}
   0xd   :  { %44 = dma.hbm_to_vmem [thread:$0]  %s562_s4, 16, %s42_s10, [#allocation6]  }
   0xe   :  { %s402_s17 = scalar_lea.vmem %s25_s12, 128  ;;  %p407_p6 = scmp.lt.s32.totalorder %s25_s12, %s25_s12 }
   0xf   :  { %p403_p5 = scmp.ne.s32.totalorder %s25_s12, %s402_s17  ;;  %p408_p7 = scmp.lt.s32.totalorder %s402_s17, %s402_s17 }
  0x11   :  { %p409_p8 = por %p408_p7, %p407_p6 }
  0x13   :  { %p410_p9 = pnand %p409_p8, %p403_p5 }
  0x15   :  { %413 = shalt.err (!%p410_p9)
}
  0x16   :  { %s462_s18 = smov 64   ;;  %s463_s19 = smov 4  }
  0x17   :  { %30 = dma.hbm_to_vmem [thread:$0]  %s559_s1, 128, %s25_s12, [#allocation3], %s462_s18, %s462_s18, %s463_s19  }
  0x18   :  { %s464_s22 = smov [#allocation7]  }
  0x19   :  { %s51_s23 = sshll.u32 %s464_s22, 4  ;;  %s52_s23 = int_to_ptr.vmem [resolvable:$true] %s51_s23 }
  0x1a   :  { %s422_s24 = scalar_lea.vmem %s52_s23, 16  ;;  %s426_s25 = scalar_lea.vmem %s52_s23, 32 }
  0x1b   :  { %p423_p10 = scmp.ne.s32.totalorder %s52_s23, %s422_s24  ;;  %p427_p11 = scmp.lt.s32.totalorder %s52_s23, %s52_s23 }
  0x1c   :  { %p428_p12 = scmp.lt.s32.totalorder %s426_s25, %s422_s24 }
  0x1e   :  { %p429_p13 = por %p428_p12, %p427_p11 }
  0x20   :  { %p430_p0 = pnand %p429_p13, %p423_p10 }
  0x22   :  { %433 = shalt.err (!%p430_p0)
}
  0x23   :  { %54 = dma.hbm_to_vmem [thread:$0]  %s563_s5, 16, %s52_s23, [#allocation6]  }
  0x24   :  { %454 = dma.done.wait [#allocation3], 128  }
  0x25   :  { %455 = vsyncadd [#allocation3], 4294967168 }
  0x26   :  { %456 = dma.done.wait [#allocation6], 32  }
  0x27   :  { %457 = vsyncadd [#allocation6], 4294967264  ;;  %v465_v0 = vmov 0.0   ;;  %vm466_vm0 = vmmov 0   ;;  %v367_v1 = vld [vmem:[#allocation2] sm:$0xff]   ;;  %vm88_vm1 = vcmask 130048  }
  0x28   :  { %337 = vmatprep.subr.bf16.mxu0 %v465_v0  ;;  %339 = vmatprep.mubr.msk.bf16.mxu0 %vm466_vm0, %v465_v0  ;;  %v71_v2 = vld [vmem:[%s558_s0] sm:$0xff]  ;;  %v368_v4 = vld [vmem:[%s561_s3 + $0x8] sm:$0xff]   ;;  %vm157_vm2 = vcmask 261120   ;;  %s467_s16 = smov [#allocation8]   ;;  %vm298_vm3 = vcmask 64512  }
  0x29   :  { %343 = vmatprep.subr.bf16.mxu1 %v465_v0  ;;  %347 = vmatprep.mubr.msk.bf16.mxu1 %vm466_vm0, %v465_v0  ;;  %v72_v3 = vpack.c.bf16 %v71_v2, %v71_v2  ;;  %v369_v5 = vld [vmem:[%s561_s3] sm:$0xff]   ;;  %v319_v14 = vld [vmem:[#allocation5] ss:$0 sm:$0xff]  ;;  %v323_v32 = vld [vmem:[#allocation7] ss:$0 sm:$0xff]  ;;  %s306_s17 = sshll.u32 %s467_s16, 4  ;;  %s307_s17 = int_to_ptr.vmem [resolvable:$true] %s306_s17 }
  0x2a   :  { %338 = vmatpush3.bf16.msra.mxu0 %v367_v1  ;;  %344 = vmatpush3.bf16.msra.mxu1 %v368_v4  ;;  %v316_v6 = vld [vmem:[%s560_s2] ss:$0 sm:$0xff]  ;;  %v370_v26 = vld [vmem:[%s565_s7 + $0x8] sm:$0xff]   ;;  %p439_p2 = scmp.lt.s32.totalorder %s307_s17, %s307_s17 }
  0x2b   :  { %351 = vmatprep.subr.bf16.mxu0 %v465_v0  ;;  %345 = vmatprep.subr.bf16.mxu1 %v465_v0  ;;  %v371_v27 = vld [vmem:[%s565_s7] sm:$0xff]  }
  0x2c   :  { %v324_v34 = vld [vmem:[%s564_s6] ss:$0 sm:$0xff]  ;;  %s434_s6 = scalar_lea.vmem %s307_s17, 128 }
  0x2d   :  { %340 = vmatmul.mubr.msk.bf16.vlgmr.msra.gmra.mxu0 %vm88_vm1, %v72_v3  ;;  %v325_v39 = vld [vmem:[%s566_s8] ss:$0 sm:$0xff]  ;;  %p435_p1 = scmp.ne.s32.totalorder %s307_s17, %s434_s6  ;;  %p440_p3 = scmp.lt.s32.totalorder %s434_s6, %s434_s6 }
  0x2e   :  { %355 = vmatprep.mubr.msk.bf16.mxu0 %vm466_vm0, %v465_v0  ;;  %346 = vmatpush3.bf16.msra.mxu1 %v369_v5 }
  0x2f   :  { %352 = vmatpush3.bf16.msra.mxu0 %v370_v26  ;;  %p441_p4 = por %p440_p3, %p439_p2 }
  0x30   :  { %353 = vmatprep.subr.bf16.mxu0 %v465_v0 }
  0x31   :  { %p442_p5 = pnand %p441_p4, %p435_p1 }
  0x33   :  { %354 = vmatpush3.bf16.msra.mxu0 %v371_v27 }
  0xed   :  { %v126_v7 = vpop.f32.mrf.mxu0 }
  0xee   :  { %v127_v8 = vadd.f32 %v316_v6, %v126_v7 }
  0xef   :  { %v341_v9 = vpop.f32.mrf.mxu0 }
  0xf0   :  { %v132_v10 = vmax.f32 %v127_v8, 0.0 }
  0xf1   :  { %v129_v11 = vpop.f32.mrf.mxu0 }
  0xf2   :  { %v133_v12 = vpack.c.bf16 %v132_v10, %v132_v10 }
  0xf3   :  { %v342_v13 = vpop.f32.mrf.mxu0 }
  0xf4   :  { %348 = vmatmul.mubr.msk.bf16.vlgmr.msra.gmra.mxu1 %vm157_vm2, %v133_v12 }
 0x1b4   :  { %v195_v15 = vpop.f32.mrf.mxu1 }
 0x1b5   :  { %v196_v16 = vadd.f32 %v319_v14, %v195_v15 }
 0x1b6   :  { %v349_v17 = vpop.f32.mrf.mxu1 }
 0x1b7   :  { %v201_v18 = vsel %vm157_vm2, %v196_v16, 0.0 }
 0x1b8   :  { %202 = vadd.xlane.f32.xlu0 %v201_v18  ;;  %v198_v19 = vpop.f32.mrf.mxu1 }
 0x1ba   :  { %v350_v20 = vpop.f32.mrf.mxu1 }
 0x241   :  { %v203_v21 = vpop.xlane.xlu0 %202 }
 0x242   :  { %v204_v22 = vmul.f32 0.03125, %v203_v21 }
 0x244   :  { %v205_v23 = vsub.f32 %v196_v16, %v204_v22 }
 0x246   :  { %v206_v24 = vmul.f32 %v205_v23, %v205_v23 }
 0x248   :  { %v207_v25 = vsel %vm157_vm2, %v206_v24, 0.0 }
 0x249   :  { %208 = vadd.xlane.f32.xlu0 %v207_v25 }
 0x2d2   :  { %v209_v28 = vpop.xlane.xlu0 %208 }
 0x2d3   :  { %v210_v29 = vmul.f32 0.03125, %v209_v28 }
 0x2d5   :  { %v211_v30 = vadd.f32 1e-05, %v210_v29 }
 0x2d7   :  { %372 = vrsqrt.f32 %v211_v30 }
 0x2e4   :  { %v373_v31 = vpop.eup %372 }
 0x2e5   :  { %v213_v33 = vmul.f32 %v373_v31, %v205_v23 }
 0x2e7   :  { %v221_v35 = vmul.f32 %v323_v32, %v213_v33 }
 0x2e9   :  { %v229_v36 = vadd.f32 %v324_v34, %v221_v35 }
 0x2eb   :  { %v230_v37 = vmax.f32 %v229_v36, 0.0 }
 0x2ed   :  { %v231_v38 = vpack.c.bf16 %v230_v37, %v230_v37 }
 0x2ef   :  { %356 = vmatmul.mubr.msk.bf16.vlgmr.msra.gmra.mxu0 %vm157_vm2, %v231_v38 }
 0x3af   :  { %v292_v40 = vpop.f32.mrf.mxu0 }
 0x3b0   :  { %v293_v41 = vadd.f32 %v325_v39, %v292_v40 }
 0x3b1   :  { %v357_v42 = vpop.f32.mrf.mxu0 }
 0x3b2   :  { %299 = vst.msk [vmem:[#allocation8] sm:$0xff] %vm298_vm3, %v293_v41 }
 0x3b3   :  { %v295_v43 = vpop.f32.mrf.mxu0 }
 0x3b4   :  { %445 = shalt.err (!%p442_p5)
}
 0x3b5   :  { %309 = dma.vmem_to_hbm [thread:$0]  %s307_s17, 128, %s567_s9, [#allocation4]   ;;  %v358_v44 = vpop.f32.mrf.mxu0 }
 0x3b6   :  { %458 = dma.done.wait [#allocation4], 128  }
 0x3b7   :  { %459 = vsyncadd [#allocation4], 4294967168 }
 0x3b8   :  { %313 = vsyncpa [#allocation3], 1 }
 0x3b9   :  { %314 = vsyncpa [#allocation6], 1 }
 0x3ba   :  { %315 = vsyncpa [#allocation4], 1 }

// kernel: tpu_custom_call.1
= control target key start
LH: loop header
LB: loop body
LE: loop exit
PB: predicated region body
PF: predicated region fallthrough
CT: control target
= control target key end

     0   :  { %14 = vsyncpa [#allocation3], 0  ;;  %s558_s0 = inlined_call_operand.vmem [shape: f32[8,16], index: 0, kind: input, shape index: {}]   ;;  %s559_s1 = inlined_call_operand.hbm [shape: bf16[16,32], index: 1, kind: input, shape index: {}]   ;;  %s560_s2 = inlined_call_operand.vmem [shape: f32[1,32], index: 2, kind: input, shape index: {}]   ;;  %s561_s3 = inlined_call_operand.vmem [shape: bf16[32,32], index: 3, kind: input, shape index: {}]   ;;  %s562_s4 = inlined_call_operand.hbm [shape: f32[1,32], index: 4, kind: input, shape index: {}]   ;;  %s563_s5 = inlined_call_operand.hbm [shape: f32[1,32], index: 5, kind: input, shape index: {}]   ;;  %s564_s6 = inlined_call_operand.vmem [shape: f32[1,32], index: 6, kind: input, shape index: {}]   ;;  %s565_s7 = inlined_call_operand.vmem [shape: bf16[32,8], index: 7, kind: input, shape index: {}]   ;;  %s566_s8 = inlined_call_operand.vmem [shape: f32[1,8], index: 8, kind: input, shape index: {}]   ;;  %s567_s9 = inlined_call_operand.hbm [shape: f32[8,8], index: 9, kind: output, shape index: {}]  }
   0x1   :  { %15 = vsyncpa [#allocation6], 0 }
   0x2   :  { %16 = vsyncpa [#allocation4], 0  ;;  %s460_s30 = smov [#allocation5]   ;;  %s461_s11 = smov [#allocation2]  }
   0x3   :  { %s41_s10 = sshll.u32 %s460_s30, 4  ;;  %s24_s12 = sshll.u32 %s461_s11, 4  ;;  %s42_s10 = int_to_ptr.vmem [resolvable:$true] %s41_s10  ;;  %s25_s12 = int_to_ptr.vmem [resolvable:$true] %s24_s12 }
   0x4   :  { %s382_s13 = scalar_lea.vmem %s42_s10, 16  ;;  %s386_s14 = scalar_lea.vmem %s42_s10, 32 }
   0x5   :  { %p383_p0 = scmp.ne.s32.totalorder %s42_s10, %s382_s13  ;;  %p387_p1 = scmp.lt.s32.totalorder %s42_s10, %s42_s10 }
   0x6   :  { %p388_p2 = scmp.lt.s32.totalorder %s386_s14, %s382_s13 }
   0x8   :  { %p389_p3 = por %p388_p2, %p387_p1 }
   0xa   :  { %p390_p4 = pnand %p389_p3, %p383_p0 }
   0xc   :  { %393 = shalt.err (!%p390_p4)
}
   0xd   :  { %44 = dma.hbm_to_vmem [thread:$0]  %s562_s4, 16, %s42_s10, [#allocation6]  }
   0xe   :  { %s402_s17 = scalar_lea.vmem %s25_s12, 128  ;;  %p407_p6 = scmp.lt.s32.totalorder %s25_s12, %s25_s12 }
   0xf   :  { %p403_p5 = scmp.ne.s32.totalorder %s25_s12, %s402_s17  ;;  %p408_p7 = scmp.lt.s32.totalorder %s402_s17, %s402_s17 }
  0x11   :  { %p409_p8 = por %p408_p7, %p407_p6 }
  0x13   :  { %p410_p9 = pnand %p409_p8, %p403_p5 }
  0x15   :  { %413 = shalt.err (!%p410_p9)
}
  0x16   :  { %s462_s18 = smov 64   ;;  %s463_s19 = smov 4  }
  0x17   :  { %30 = dma.hbm_to_vmem [thread:$0]  %s559_s1, 128, %s25_s12, [#allocation3], %s462_s18, %s462_s18, %s463_s19  }
  0x18   :  { %s464_s22 = smov [#allocation7]  }
  0x19   :  { %s51_s23 = sshll.u32 %s464_s22, 4  ;;  %s52_s23 = int_to_ptr.vmem [resolvable:$true] %s51_s23 }
  0x1a   :  { %s422_s24 = scalar_lea.vmem %s52_s23, 16  ;;  %s426_s25 = scalar_lea.vmem %s52_s23, 32 }
  0x1b   :  { %p423_p10 = scmp.ne.s32.totalorder %s52_s23, %s422_s24  ;;  %p427_p11 = scmp.lt.s32.totalorder %s52_s23, %s52_s23 }
  0x1c   :  { %p428_p12 = scmp.lt.s32.totalorder %s426_s25, %s422_s24 }
  0x1e   :  { %p429_p13 = por %p428_p12, %p427_p11 }
  0x20   :  { %p430_p0 = pnand %p429_p13, %p423_p10 }
  0x22   :  { %433 = shalt.err (!%p430_p0)
}
  0x23   :  { %54 = dma.hbm_to_vmem [thread:$0]  %s563_s5, 16, %s52_s23, [#allocation6]  }
  0x24   :  { %454 = dma.done.wait [#allocation3], 128  }
  0x25   :  { %455 = vsyncadd [#allocation3], 4294967168 }
  0x26   :  { %456 = dma.done.wait [#allocation6], 32  }
  0x27   :  { %457 = vsyncadd [#allocation6], 4294967264  ;;  %v465_v0 = vmov 0.0   ;;  %vm466_vm0 = vmmov 0   ;;  %v367_v1 = vld [vmem:[#allocation2] sm:$0xff]   ;;  %vm88_vm1 = vcmask 130048  }
  0x28   :  { %337 = vmatprep.subr.bf16.mxu0 %v465_v0  ;;  %339 = vmatprep.mubr.msk.bf16.mxu0 %vm466_vm0, %v465_v0  ;;  %v71_v2 = vld [vmem:[%s558_s0] sm:$0xff]  ;;  %v368_v4 = vld [vmem:[%s561_s3 + $0x8] sm:$0xff]   ;;  %vm157_vm2 = vcmask 261120   ;;  %s467_s16 = smov [#allocation8]   ;;  %vm298_vm3 = vcmask 64512  }
  0x29   :  { %343 = vmatprep.subr.bf16.mxu1 %v465_v0  ;;  %347 = vmatprep.mubr.msk.bf16.mxu1 %vm466_vm0, %v465_v0  ;;  %v72_v3 = vpack.c.bf16 %v71_v2, %v71_v2  ;;  %v369_v5 = vld [vmem:[%s561_s3] sm:$0xff]   ;;  %v319_v14 = vld [vmem:[#allocation5] ss:$0 sm:$0xff]  ;;  %v323_v32 = vld [vmem:[#allocation7] ss:$0 sm:$0xff]  ;;  %s306_s17 = sshll.u32 %s467_s16, 4  ;;  %s307_s17 = int_to_ptr.vmem [resolvable:$true] %s306_s17 }
  0x2a   :  { %338 = vmatpush3.bf16.msra.mxu0 %v367_v1  ;;  %344 = vmatpush3.bf16.msra.mxu1 %v368_v4  ;;  %v316_v6 = vld [vmem:[%s560_s2] ss:$0 sm:$0xff]  ;;  %v370_v26 = vld [vmem:[%s565_s7 + $0x8] sm:$0xff]   ;;  %p439_p2 = scmp.lt.s32.totalorder %s307_s17, %s307_s17 }
  0x2b   :  { %351 = vmatprep.subr.bf16.mxu0 %v465_v0  ;;  %345 = vmatprep.subr.bf16.mxu1 %v465_v0  ;;  %v371_v27 = vld [vmem:[%s565_s7] sm:$0xff]  }
  0x2c   :  { %v324_v34 = vld [vmem:[%s564_s6] ss:$0 sm:$0xff]  ;;  %s434_s6 = scalar_lea.vmem %s307_s17, 128 }
  0x2d   :  { %340 = vmatmul.mubr.msk.bf16.vlgmr.msra.gmra.mxu0 %vm88_vm1, %v72_v3  ;;  %v325_v39 = vld [vmem:[%s566_s8] ss:$0 sm:$0xff]  ;;  %p435_p1 = scmp.ne.s32.totalorder %s307_s17, %s434_s6  ;;  %p440_p3 = scmp.lt.s32.totalorder %s434_s6, %s434_s6 }
  0x2e   :  { %355 = vmatprep.mubr.msk.bf16.mxu0 %vm466_vm0, %v465_v0  ;;  %346 = vmatpush3.bf16.msra.mxu1 %v369_v5 }
  0x2f   :  { %352 = vmatpush3.bf16.msra.mxu0 %v370_v26  ;;  %p441_p4 = por %p440_p3, %p439_p2 }
  0x30   :  { %353 = vmatprep.subr.bf16.mxu0 %v465_v0 }
  0x31   :  { %p442_p5 = pnand %p441_p4, %p435_p1 }
  0x33   :  { %354 = vmatpush3.bf16.msra.mxu0 %v371_v27 }
  0xed   :  { %v126_v7 = vpop.f32.mrf.mxu0 }
  0xee   :  { %v127_v8 = vadd.f32 %v316_v6, %v126_v7 }
  0xef   :  { %v341_v9 = vpop.f32.mrf.mxu0 }
  0xf0   :  { %v132_v10 = vmax.f32 %v127_v8, 0.0 }
  0xf1   :  { %v129_v11 = vpop.f32.mrf.mxu0 }
  0xf2   :  { %v133_v12 = vpack.c.bf16 %v132_v10, %v132_v10 }
  0xf3   :  { %v342_v13 = vpop.f32.mrf.mxu0 }
  0xf4   :  { %348 = vmatmul.mubr.msk.bf16.vlgmr.msra.gmra.mxu1 %vm157_vm2, %v133_v12 }
 0x1b4   :  { %v195_v15 = vpop.f32.mrf.mxu1 }
 0x1b5   :  { %v196_v16 = vadd.f32 %v319_v14, %v195_v15 }
 0x1b6   :  { %v349_v17 = vpop.f32.mrf.mxu1 }
 0x1b7   :  { %v201_v18 = vsel %vm157_vm2, %v196_v16, 0.0 }
 0x1b8   :  { %202 = vadd.xlane.f32.xlu0 %v201_v18  ;;  %v198_v19 = vpop.f32.mrf.mxu1 }
 0x1ba   :  { %v350_v20 = vpop.f32.mrf.mxu1 }
 0x241   :  { %v203_v21 = vpop.xlane.xlu0 %202 }
 0x242   :  { %v204_v22 = vmul.f32 0.03125, %v203_v21 }
 0x244   :  { %v205_v23 = vsub.f32 %v196_v16, %v204_v22 }
 0x246   :  { %v206_v24 = vmul.f32 %v205_v23, %v205_v23 }
 0x248   :  { %v207_v25 = vsel %vm157_vm2, %v206_v24, 0.0 }
 0x249   :  { %208 = vadd.xlane.f32.xlu0 %v207_v25 }
 0x2d2   :  { %v209_v28 = vpop.xlane.xlu0 %208 }
 0x2d3   :  { %v210_v29 = vmul.f32 0.03125, %v209_v28 }
 0x2d5   :  { %v211_v30 = vadd.f32 1e-05, %v210_v29 }
 0x2d7   :  { %372 = vrsqrt.f32 %v211_v30 }
 0x2e4   :  { %v373_v31 = vpop.eup %372 }
 0x2e5   :  { %v213_v33 = vmul.f32 %v373_v31, %v205_v23 }
 0x2e7   :  { %v221_v35 = vmul.f32 %v323_v32, %v213_v33 }
 0x2e9   :  { %v229_v36 = vadd.f32 %v324_v34, %v221_v35 }
 0x2eb   :  { %v230_v37 = vmax.f32 %v229_v36, 0.0 }
 0x2ed   :  { %v231_v38 = vpack.c.bf16 %v230_v37, %v230_v37 }
 0x2ef   :  { %356 = vmatmul.mubr.msk.bf16.vlgmr.msra.gmra.mxu0 %vm157_vm2, %v231_v38 }
 0x3af   :  { %v292_v40 = vpop.f32.mrf.mxu0 }
 0x3b0   :  { %v293_v41 = vadd.f32 %v325_v39, %v292_v40 }
 0x3b1   :  { %v357_v42 = vpop.f32.mrf.mxu0 }
 0x3b2   :  { %299 = vst.msk [vmem:[#allocation8] sm:$0xff] %vm298_vm3, %v293_v41 }
 0x3b3   :  { %v295_v43 = vpop.f32.mrf.mxu0 }
 0x3b4   :  { %445 = shalt.err (!%p442_p5)
}
 0x3b5   :  { %309 = dma.vmem_to_hbm [thread:$0]  %s307_s17, 128, %s567_s9, [#allocation4]   ;;  %v358_v44 = vpop.f32.mrf.mxu0 }
 0x3b6   :  { %458 = dma.done.wait [#allocation4], 128  }
 0x3b7   :  { %459 = vsyncadd [#allocation4], 4294967168 }
 0x3b8   :  { %313 = vsyncpa [#allocation3], 1 }
 0x3b9   :  { %314 = vsyncpa [#allocation6], 1 }
 0x3ba   :  { %315 = vsyncpa [#allocation4], 1 }

</bundles_post_ra>
